<compile_context>
chip_gen: v7x
topology: tpu7x:2x2x1
jax: 0.10.0
libtpu: 0.0.40
codegen_flags: <defaults>
</compile_context>

<pallas_src>
import jax
import jax.numpy as jnp
import numpy as np
from jax.experimental import pallas as pl
from jax.experimental.pallas import tpu as pltpu


def _make_lstm_kernel(chunk_t, hidden, tail_steps, unroll):
    """Recurrence kernel.  Gate order follows PyTorch nn.LSTM: [i, f, g, o]."""

    def kernel(x_ref, wih_ref, whh_ref, h_ref, c_sc):
        c_idx = pl.program_id(1)            # time-chunk axis (axis 0 = batch tile)

        @pl.when(c_idx == 0)
        def _():                            # fresh state at the start of each batch tile
            h_ref[...] = jnp.zeros_like(h_ref)
            c_sc[...] = jnp.zeros_like(c_sc)

        wih = wih_ref[...]                  # (F', 4H) f32  — loaded once per chunk
        whh = whh_ref[...]                  # (H,  4H) bf16 — loaded once per chunk

        def step(t, carry):
            h_prev, c_prev = carry
            # Input projection (+ bias via the ones-feature).  Independent of
            # h_prev -> off the serial dependence chain.
            pre = jnp.dot(x_ref[t], wih, preferred_element_type=jnp.float32)
            # Recurrent projection: the only matmul on the serial chain.
            # Single-pass bf16 MXU, f32 accumulation.
            rec = jnp.dot(h_prev.astype(jnp.bfloat16), whh,
                          preferred_element_type=jnp.float32)
            gates = pre + rec                                   # (Bt, 4H)
            # One sigmoid pass over the whole (Bt, 4H) vreg; the g-gate
            # columns were pre-scaled by 2, so tanh(x) = 2*sigmoid(2x) - 1.
            act = jax.nn.sigmoid(gates)
            i_g = act[:, 0 * hidden:1 * hidden]
            f_g = act[:, 1 * hidden:2 * hidden]
            g_s = act[:, 2 * hidden:3 * hidden]
            o_g = act[:, 3 * hidden:4 * hidden]
            c_new = f_g * c_prev + i_g * (2.0 * g_s - 1.0)
            h_new = o_g * jnp.tanh(c_new)
            return (h_new, c_new)

        carry0 = (h_ref[...], c_sc[...])

        if tail_steps is None:              # chunk divides T: static trip count
            h_fin, c_fin = jax.lax.fori_loop(0, chunk_t, step, carry0,
                                             unroll=unroll)
        else:                               # ragged tail: static count per branch
            is_last = c_idx == pl.num_programs(1) - 1
            h_fin, c_fin = jax.lax.cond(
                is_last,
                lambda: jax.lax.fori_loop(0, tail_steps, step, carry0,
                                          unroll=unroll),
                lambda: jax.lax.fori_loop(0, chunk_t, step, carry0,
                                          unroll=unroll),
            )

        h_ref[...] = h_fin                  # output block doubles as h state
        c_sc[...] = c_fin

    return kernel


def shallow_regression_lstm(x, params, *, max_time_chunk=512, max_batch_tile=256):
    """x: (B, T, F) float32.  Returns (B,) float32 (PyTorch forward + .flatten())."""
    B, T, F = x.shape
    w_ih = params["w_ih"]                        # (4H, F)  PyTorch layout
    w_hh = params["w_hh"]                        # (4H, H)
    bias = params["b_ih"] + params["b_hh"]       # (4H,)
    w_lin = params["w_lin"]                      # (1, H)
    b_lin = params["b_lin"]                      # (1,)
    H = w_hh.shape[1]
    G = 4 * H

    # Pre-scale the g-gate rows (PyTorch packing [i, f, g, o]) by 2 so the
    # kernel needs a single full-vreg sigmoid: tanh(x) = 2*sigmoid(2x) - 1.
    gate_scale = jnp.ones((G, 1), jnp.float32).at[2 * H:3 * H].set(2.0)
    wih_t = (w_ih.astype(jnp.float32) * gate_scale).T                    # (F, 4H)
    b_row = (bias.astype(jnp.float32) * gate_scale[:, 0])[None, :]       # (1, 4H)
    whh_bf = ((w_hh.astype(jnp.float32) * gate_scale).T
              ).astype(jnp.bfloat16)                                     # (H, 4H) bf16

    # Fold the bias into W_ih via a ones-feature; pad features to a multiple of 8.
    F1 = F + 1
    Fp = ((F1 + 7) // 8) * 8
    wih_aug = jnp.concatenate(
        [wih_t, b_row, jnp.zeros((Fp - F1, G), jnp.float32)], axis=0)    # (Fp, 4H)

    # Batch padding / tiling (sublane multiple of 8; batch tiles run "parallel").
    Bp = max(8, ((B + 7) // 8) * 8)
    if Bp > max_batch_tile:
        Bt = max_batch_tile
        Bp = ((Bp + Bt - 1) // Bt) * Bt
    else:
        Bt = Bp

    # Time chunk sized from a conservative VMEM budget (double-buffered x block),
    # safe on v7x's 64 MiB VMEM and well under the v5e 16 MiB scoped default.
    budget_bytes = 6 * 1024 * 1024
    chunk = int(min(T, max_time_chunk, max(8, budget_bytes // (2 * Bt * Fp * 4))))
    num_chunks = -(-T // chunk)
    Tp = num_chunks * chunk
    rem = T - (num_chunks - 1) * chunk
    tail_steps = None if rem == chunk else rem
    unroll = True if chunk <= 32 else 8

    # Pad the *small raw input* (not a (T,B,4H) intermediate) and go time-major.
    x_aug = jnp.concatenate(
        [x.astype(jnp.float32),
         jnp.ones((B, T, 1), jnp.float32),
         jnp.zeros((B, T, Fp - F1), jnp.float32)], axis=-1)              # (B, T, Fp)
    x_tm = jnp.transpose(x_aug, (1, 0, 2))                               # (T, B, Fp)
    x_p = jnp.pad(x_tm, ((0, Tp - T), (0, Bp - B), (0, 0)))              # (Tp, Bp, Fp)

    kernel = _make_lstm_kernel(chunk, H, tail_steps, unroll)

    h_fin = pl.pallas_call(
        kernel,
        out_shape=jax.ShapeDtypeStruct((Bp, H), jnp.float32),
        grid_spec=pltpu.PrefetchScalarGridSpec(
            num_scalar_prefetch=0,
            grid=(Bp // Bt, num_chunks),                     # (batch tiles, time chunks)
            in_specs=[
                pl.BlockSpec((chunk, Bt, Fp), lambda b, c: (c, b, 0)),   # x chunk (streamed)
                pl.BlockSpec((Fp, G), lambda b, c: (0, 0)),              # W_ih^T | bias (f32)
                pl.BlockSpec((H, G), lambda b, c: (0, 0)),               # W_hh^T (bf16)
            ],
            out_specs=pl.BlockSpec((Bt, H), lambda b, c: (b, 0)),        # final h (resident)
            scratch_shapes=[
                pltpu.VMEM((Bt, H), jnp.float32),            # cell state c (persists)
            ],
        ),
        compiler_params=pltpu.CompilerParams(
            dimension_semantics=("parallel", "arbitrary"),
            vmem_limit_bytes=32 * 1024 * 1024,
        ),
    )(x_p, wih_aug, whh_bf)

    # Degenerate (H, 1) Linear + bias + flatten in XLA (kernel stays lane-dense).
    out = h_fin[:B] @ w_lin.astype(jnp.float32).T + b_lin.astype(jnp.float32)
    return out.reshape(-1)


def init_params(key, num_features, hidden_units):
    """Deterministic init matching nn.LSTM / nn.Linear shapes (uniform +-1/sqrt(H))."""
    H, F = hidden_units, num_features
    k = 1.0 / np.sqrt(H)
    ks = jax.random.split(key, 6)
    return {
        "w_ih": jax.random.uniform(ks[0], (4 * H, F), jnp.float32, -k, k),
        "w_hh": jax.random.uniform(ks[1], (4 * H, H), jnp.float32, -k, k),
        "b_ih": jax.random.uniform(ks[2], (4 * H,), jnp.float32, -k, k),
        "b_hh": jax.random.uniform(ks[3], (4 * H,), jnp.float32, -k, k),
        "w_lin": jax.random.uniform(ks[4], (1, H), jnp.float32, -k, k),
        "b_lin": jax.random.uniform(ks[5], (1,), jnp.float32, -k, k),
    }


def reference_forward(x, params):
    """Pure-JAX (f32) reference of the same forward pass."""
    B, T, F = x.shape
    H = params["w_hh"].shape[1]
    wih_t = params["w_ih"].T
    whh_t = params["w_hh"].T
    b = (params["b_ih"] + params["b_hh"])[None, :]
    h = jnp.zeros((B, H), jnp.float32)
    c = jnp.zeros((B, H), jnp.float32)

    def step(carry, x_t):
        h, c = carry
        gates = x_t @ wih_t + h @ whh_t + b
        i = jax.nn.sigmoid(gates[:, 0 * H:1 * H])
        f = jax.nn.sigmoid(gates[:, 1 * H:2 * H])
        g = jnp.tanh(gates[:, 2 * H:3 * H])
        o = jax.nn.sigmoid(gates[:, 3 * H:4 * H])
        c = f * c + i * g
        h = o * jnp.tanh(c)
        return (h, c), None

    (h, _), _ = jax.lax.scan(step, (h, c), jnp.transpose(x, (1, 0, 2)))
    return (h @ params["w_lin"].T + params["b_lin"]).reshape(-1)


if __name__ == "__main__":
    B, T, F, H = 4, 8, 8, 32            # batch, seq, num_features, hidden_units
    key = jax.random.PRNGKey(0)
    k_x, k_p = jax.random.split(key)
    x = jax.random.normal(k_x, (B, T, F), jnp.float32)
    params = init_params(k_p, num_features=F, hidden_units=H)

    out = jax.block_until_ready(shallow_regression_lstm(x, params))
    ref = jax.block_until_ready(reference_forward(x, params))
    # bf16 recurrent matmul (f32 accumulate) -> slightly looser tolerance vs f32 ref.
    np.testing.assert_allclose(np.asarray(out), np.asarray(ref),
                               rtol=2e-2, atol=1e-2)
    print("KERNEL_OK")
</pallas_src>

<mosaic_0001>
module attributes {stable_mosaic.version = 11 : i64} {
  func.func @kernel(%arg0: i32, %arg1: i32, %arg2: memref<8x8x16xf32, #tpu.memory_space<vmem>>, %arg3: memref<16x128xf32, #tpu.memory_space<vmem>>, %arg4: memref<32x128xbf16, #tpu.memory_space<vmem>>, %arg5: memref<8x32xf32, #tpu.memory_space<vmem>>, %arg6: memref<8x32xf32, #tpu.memory_space<vmem>>) attributes {dimension_semantics = [#tpu.dimension_semantics<parallel>, #tpu.dimension_semantics<arbitrary>], iteration_bounds = array<i64: 1, 1>, scalar_prefetch = 0 : i64, scratch_operands = 1 : i64, tpu.core_type = #tpu.core_type<tc>, window_params = [{transform_indices = @transform_0, window_bounds = array<i64: 8, 8, 16>}, {pipeline_mode = #tpu.pipeline_mode<synchronous>, transform_indices = @transform_1, window_bounds = array<i64: 16, 128>}, {pipeline_mode = #tpu.pipeline_mode<synchronous>, transform_indices = @transform_2, window_bounds = array<i64: 32, 128>}, {transform_indices = @transform_3, window_bounds = array<i64: 8, 32>}]} {
    %c0_i32 = arith.constant 0 : i32
    %0 = arith.cmpi eq, %arg1, %c0_i32 : i32
    %1 = arith.extui %0 : i1 to i32
    %c0_i32_0 = arith.constant 0 : i32
    %2 = arith.cmpi ne, %1, %c0_i32_0 : i32
    scf.if %2 {
      %cst_68 = arith.constant 0.000000e+00 : f32
      %209 = vector.broadcast %cst_68 : f32 to vector<8x32xf32>
      %c0_69 = arith.constant 0 : index
      %c0_70 = arith.constant 0 : index
      %210 = vector.load %arg5[%c0_69, %c0_70] : memref<8x32xf32, #tpu.memory_space<vmem>>, vector<8x32xf32>
      tpu.vector_store %arg5[%c0_69, %c0_70], %209 {strides = array<i32>} : memref<8x32xf32, #tpu.memory_space<vmem>>, vector<8x32xf32>,
      %cst_71 = arith.constant 0.000000e+00 : f32
      %211 = vector.broadcast %cst_71 : f32 to vector<8x32xf32>
      %c0_72 = arith.constant 0 : index
      %c0_73 = arith.constant 0 : index
      %212 = vector.load %arg6[%c0_72, %c0_73] : memref<8x32xf32, #tpu.memory_space<vmem>>, vector<8x32xf32>
      tpu.vector_store %arg6[%c0_72, %c0_73], %211 {strides = array<i32>} : memref<8x32xf32, #tpu.memory_space<vmem>>, vector<8x32xf32>,
    } else {
    }
    %c0 = arith.constant 0 : index
    %c0_1 = arith.constant 0 : index
    %3 = vector.load %arg3[%c0, %c0_1] : memref<16x128xf32, #tpu.memory_space<vmem>>, vector<16x128xf32>
    %c0_2 = arith.constant 0 : index
    %c0_3 = arith.constant 0 : index
    %4 = vector.load %arg4[%c0_2, %c0_3] : memref<32x128xbf16, #tpu.memory_space<vmem>>, vector<32x128xbf16>
    %c0_4 = arith.constant 0 : index
    %c0_5 = arith.constant 0 : index
    %5 = vector.load %arg5[%c0_4, %c0_5] : memref<8x32xf32, #tpu.memory_space<vmem>>, vector<8x32xf32>
    %c0_6 = arith.constant 0 : index
    %c0_7 = arith.constant 0 : index
    %6 = vector.load %arg6[%c0_6, %c0_7] : memref<8x32xf32, #tpu.memory_space<vmem>>, vector<8x32xf32>
    %c0_i32_8 = arith.constant 0 : i32
    %7 = arith.index_cast %c0_i32_8 : i32 to index
    %c0_9 = arith.constant 0 : index
    %c0_10 = arith.constant 0 : index
    %8 = vector.load %arg2[%7, %c0_9, %c0_10] : memref<8x8x16xf32, #tpu.memory_space<vmem>>, vector<1x8x16xf32>
    %9 = vector.shape_cast %8 : vector<1x8x16xf32> to vector<8x16xf32>
    %cst = arith.constant dense<0.000000e+00> : vector<8x128xf32>
    %10 = tpu.matmul %9, %3, %cst {dimension_numbers = #tpu.dot_dimension_numbers<[1], [0], [0], [1], [0, 0, 1, 1], [], []>} : vector<8x16xf32>, vector<16x128xf32>, vector<8x128xf32> -> vector<8x128xf32>
    %11 = arith.truncf %5 : vector<8x32xf32> to vector<8x32xbf16>
    %cst_11 = arith.constant dense<0.000000e+00> : vector<8x128xf32>
    %12 = tpu.matmul %11, %4, %cst_11 {dimension_numbers = #tpu.dot_dimension_numbers<[1], [0], [0], [1], [0, 0, 1, 1], [], []>} : vector<8x32xbf16>, vector<32x128xbf16>, vector<8x128xf32> -> vector<8x128xf32>
    %13 = arith.addf %10, %12 : vector<8x128xf32>
    %14 = arith.negf %13 : vector<8x128xf32>
    %15 = math.exp %14 : vector<8x128xf32>
    %cst_12 = arith.constant 1.000000e+00 : f32
    %16 = vector.broadcast %cst_12 : f32 to vector<8x128xf32>
    %17 = arith.addf %16, %15 : vector<8x128xf32>
    %18 = arith.divf %16, %17 : vector<8x128xf32>
    %19 = vector.extract_strided_slice %18 {offsets = [0, 0], sizes = [8, 32], strides = [1, 1]} : vector<8x128xf32> to vector<8x32xf32>
    %20 = vector.extract_strided_slice %18 {offsets = [0, 32], sizes = [8, 32], strides = [1, 1]} : vector<8x128xf32> to vector<8x32xf32>
    %21 = vector.extract_strided_slice %18 {offsets = [0, 64], sizes = [8, 32], strides = [1, 1]} : vector<8x128xf32> to vector<8x32xf32>
    %22 = vector.extract_strided_slice %18 {offsets = [0, 96], sizes = [8, 32], strides = [1, 1]} : vector<8x128xf32> to vector<8x32xf32>
    %23 = arith.mulf %20, %6 : vector<8x32xf32>
    %cst_13 = arith.constant 2.000000e+00 : f32
    %24 = vector.broadcast %cst_13 : f32 to vector<8x32xf32>
    %25 = arith.mulf %24, %21 : vector<8x32xf32>
    %cst_14 = arith.constant 1.000000e+00 : f32
    %26 = vector.broadcast %cst_14 : f32 to vector<8x32xf32>
    %27 = arith.subf %25, %26 : vector<8x32xf32>
    %28 = arith.mulf %19, %27 : vector<8x32xf32>
    %29 = arith.addf %23, %28 : vector<8x32xf32>
    %30 = math.tanh %29 : vector<8x32xf32>
    %31 = arith.mulf %22, %30 : vector<8x32xf32>
    %c1_i32 = arith.constant 1 : i32
    %32 = arith.index_cast %c1_i32 : i32 to index
    %c0_15 = arith.constant 0 : index
    %c0_16 = arith.constant 0 : index
    %33 = vector.load %arg2[%32, %c0_15, %c0_16] : memref<8x8x16xf32, #tpu.memory_space<vmem>>, vector<1x8x16xf32>
    %34 = vector.shape_cast %33 : vector<1x8x16xf32> to vector<8x16xf32>
    %cst_17 = arith.constant dense<0.000000e+00> : vector<8x128xf32>
    %35 = tpu.matmul %34, %3, %cst_17 {dimension_numbers = #tpu.dot_dimension_numbers<[1], [0], [0], [1], [0, 0, 1, 1], [], []>} : vector<8x16xf32>, vector<16x128xf32>, vector<8x128xf32> -> vector<8x128xf32>
    %36 = arith.truncf %31 : vector<8x32xf32> to vector<8x32xbf16>
    %cst_18 = arith.constant dense<0.000000e+00> : vector<8x128xf32>
    %37 = tpu.matmul %36, %4, %cst_18 {dimension_numbers = #tpu.dot_dimension_numbers<[1], [0], [0], [1], [0, 0, 1, 1], [], []>} : vector<8x32xbf16>, vector<32x128xbf16>, vector<8x128xf32> -> vector<8x128xf32>
    %38 = arith.addf %35, %37 : vector<8x128xf32>
    %39 = arith.negf %38 : vector<8x128xf32>
    %40 = math.exp %39 : vector<8x128xf32>
    %cst_19 = arith.constant 1.000000e+00 : f32
    %41 = vector.broadcast %cst_19 : f32 to vector<8x128xf32>
    %42 = arith.addf %41, %40 : vector<8x128xf32>
    %43 = arith.divf %41, %42 : vector<8x128xf32>
    %44 = vector.extract_strided_slice %43 {offsets = [0, 0], sizes = [8, 32], strides = [1, 1]} : vector<8x128xf32> to vector<8x32xf32>
    %45 = vector.extract_strided_slice %43 {offsets = [0, 32], sizes = [8, 32], strides = [1, 1]} : vector<8x128xf32> to vector<8x32xf32>
    %46 = vector.extract_strided_slice %43 {offsets = [0, 64], sizes = [8, 32], strides = [1, 1]} : vector<8x128xf32> to vector<8x32xf32>
    %47 = vector.extract_strided_slice %43 {offsets = [0, 96], sizes = [8, 32], strides = [1, 1]} : vector<8x128xf32> to vector<8x32xf32>
    %48 = arith.mulf %45, %29 : vector<8x32xf32>
    %cst_20 = arith.constant 2.000000e+00 : f32
    %49 = vector.broadcast %cst_20 : f32 to vector<8x32xf32>
    %50 = arith.mulf %49, %46 : vector<8x32xf32>
    %cst_21 = arith.constant 1.000000e+00 : f32
    %51 = vector.broadcast %cst_21 : f32 to vector<8x32xf32>
    %52 = arith.subf %50, %51 : vector<8x32xf32>
    %53 = arith.mulf %44, %52 : vector<8x32xf32>
    %54 = arith.addf %48, %53 : vector<8x32xf32>
    %55 = math.tanh %54 : vector<8x32xf32>
    %56 = arith.mulf %47, %55 : vector<8x32xf32>
    %c2_i32 = arith.constant 2 : i32
    %57 = arith.index_cast %c2_i32 : i32 to index
    %c0_22 = arith.constant 0 : index
    %c0_23 = arith.constant 0 : index
    %58 = vector.load %arg2[%57, %c0_22, %c0_23] : memref<8x8x16xf32, #tpu.memory_space<vmem>>, vector<1x8x16xf32>
    %59 = vector.shape_cast %58 : vector<1x8x16xf32> to vector<8x16xf32>
    %cst_24 = arith.constant dense<0.000000e+00> : vector<8x128xf32>
    %60 = tpu.matmul %59, %3, %cst_24 {dimension_numbers = #tpu.dot_dimension_numbers<[1], [0], [0], [1], [0, 0, 1, 1], [], []>} : vector<8x16xf32>, vector<16x128xf32>, vector<8x128xf32> -> vector<8x128xf32>
    %61 = arith.truncf %56 : vector<8x32xf32> to vector<8x32xbf16>
    %cst_25 = arith.constant dense<0.000000e+00> : vector<8x128xf32>
    %62 = tpu.matmul %61, %4, %cst_25 {dimension_numbers = #tpu.dot_dimension_numbers<[1], [0], [0], [1], [0, 0, 1, 1], [], []>} : vector<8x32xbf16>, vector<32x128xbf16>, vector<8x128xf32> -> vector<8x128xf32>
    %63 = arith.addf %60, %62 : vector<8x128xf32>
    %64 = arith.negf %63 : vector<8x128xf32>
    %65 = math.exp %64 : vector<8x128xf32>
    %cst_26 = arith.constant 1.000000e+00 : f32
    %66 = vector.broadcast %cst_26 : f32 to vector<8x128xf32>
    %67 = arith.addf %66, %65 : vector<8x128xf32>
    %68 = arith.divf %66, %67 : vector<8x128xf32>
    %69 = vector.extract_strided_slice %68 {offsets = [0, 0], sizes = [8, 32], strides = [1, 1]} : vector<8x128xf32> to vector<8x32xf32>
    %70 = vector.extract_strided_slice %68 {offsets = [0, 32], sizes = [8, 32], strides = [1, 1]} : vector<8x128xf32> to vector<8x32xf32>
    %71 = vector.extract_strided_slice %68 {offsets = [0, 64], sizes = [8, 32], strides = [1, 1]} : vector<8x128xf32> to vector<8x32xf32>
    %72 = vector.extract_strided_slice %68 {offsets = [0, 96], sizes = [8, 32], strides = [1, 1]} : vector<8x128xf32> to vector<8x32xf32>
    %73 = arith.mulf %70, %54 : vector<8x32xf32>
    %cst_27 = arith.constant 2.000000e+00 : f32
    %74 = vector.broadcast %cst_27 : f32 to vector<8x32xf32>
    %75 = arith.mulf %74, %71 : vector<8x32xf32>
    %cst_28 = arith.constant 1.000000e+00 : f32
    %76 = vector.broadcast %cst_28 : f32 to vector<8x32xf32>
    %77 = arith.subf %75, %76 : vector<8x32xf32>
    %78 = arith.mulf %69, %77 : vector<8x32xf32>
    %79 = arith.addf %73, %78 : vector<8x32xf32>
    %80 = math.tanh %79 : vector<8x32xf32>
    %81 = arith.mulf %72, %80 : vector<8x32xf32>
    %c3_i32 = arith.constant 3 : i32
    %82 = arith.index_cast %c3_i32 : i32 to index
    %c0_29 = arith.constant 0 : index
    %c0_30 = arith.constant 0 : index
    %83 = vector.load %arg2[%82, %c0_29, %c0_30] : memref<8x8x16xf32, #tpu.memory_space<vmem>>, vector<1x8x16xf32>
    %84 = vector.shape_cast %83 : vector<1x8x16xf32> to vector<8x16xf32>
    %cst_31 = arith.constant dense<0.000000e+00> : vector<8x128xf32>
    %85 = tpu.matmul %84, %3, %cst_31 {dimension_numbers = #tpu.dot_dimension_numbers<[1], [0], [0], [1], [0, 0, 1, 1], [], []>} : vector<8x16xf32>, vector<16x128xf32>, vector<8x128xf32> -> vector<8x128xf32>
    %86 = arith.truncf %81 : vector<8x32xf32> to vector<8x32xbf16>
    %cst_32 = arith.constant dense<0.000000e+00> : vector<8x128xf32>
    %87 = tpu.matmul %86, %4, %cst_32 {dimension_numbers = #tpu.dot_dimension_numbers<[1], [0], [0], [1], [0, 0, 1, 1], [], []>} : vector<8x32xbf16>, vector<32x128xbf16>, vector<8x128xf32> -> vector<8x128xf32>
    %88 = arith.addf %85, %87 : vector<8x128xf32>
    %89 = arith.negf %88 : vector<8x128xf32>
    %90 = math.exp %89 : vector<8x128xf32>
    %cst_33 = arith.constant 1.000000e+00 : f32
    %91 = vector.broadcast %cst_33 : f32 to vector<8x128xf32>
    %92 = arith.addf %91, %90 : vector<8x128xf32>
    %93 = arith.divf %91, %92 : vector<8x128xf32>
    %94 = vector.extract_strided_slice %93 {offsets = [0, 0], sizes = [8, 32], strides = [1, 1]} : vector<8x128xf32> to vector<8x32xf32>
    %95 = vector.extract_strided_slice %93 {offsets = [0, 32], sizes = [8, 32], strides = [1, 1]} : vector<8x128xf32> to vector<8x32xf32>
    %96 = vector.extract_strided_slice %93 {offsets = [0, 64], sizes = [8, 32], strides = [1, 1]} : vector<8x128xf32> to vector<8x32xf32>
    %97 = vector.extract_strided_slice %93 {offsets = [0, 96], sizes = [8, 32], strides = [1, 1]} : vector<8x128xf32> to vector<8x32xf32>
    %98 = arith.mulf %95, %79 : vector<8x32xf32>
    %cst_34 = arith.constant 2.000000e+00 : f32
    %99 = vector.broadcast %cst_34 : f32 to vector<8x32xf32>
    %100 = arith.mulf %99, %96 : vector<8x32xf32>
    %cst_35 = arith.constant 1.000000e+00 : f32
    %101 = vector.broadcast %cst_35 : f32 to vector<8x32xf32>
    %102 = arith.subf %100, %101 : vector<8x32xf32>
    %103 = arith.mulf %94, %102 : vector<8x32xf32>
    %104 = arith.addf %98, %103 : vector<8x32xf32>
    %105 = math.tanh %104 : vector<8x32xf32>
    %106 = arith.mulf %97, %105 : vector<8x32xf32>
    %c4_i32 = arith.constant 4 : i32
    %107 = arith.index_cast %c4_i32 : i32 to index
    %c0_36 = arith.constant 0 : index
    %c0_37 = arith.constant 0 : index
    %108 = vector.load %arg2[%107, %c0_36, %c0_37] : memref<8x8x16xf32, #tpu.memory_space<vmem>>, vector<1x8x16xf32>
    %109 = vector.shape_cast %108 : vector<1x8x16xf32> to vector<8x16xf32>
    %cst_38 = arith.constant dense<0.000000e+00> : vector<8x128xf32>
    %110 = tpu.matmul %109, %3, %cst_38 {dimension_numbers = #tpu.dot_dimension_numbers<[1], [0], [0], [1], [0, 0, 1, 1], [], []>} : vector<8x16xf32>, vector<16x128xf32>, vector<8x128xf32> -> vector<8x128xf32>
    %111 = arith.truncf %106 : vector<8x32xf32> to vector<8x32xbf16>
    %cst_39 = arith.constant dense<0.000000e+00> : vector<8x128xf32>
    %112 = tpu.matmul %111, %4, %cst_39 {dimension_numbers = #tpu.dot_dimension_numbers<[1], [0], [0], [1], [0, 0, 1, 1], [], []>} : vector<8x32xbf16>, vector<32x128xbf16>, vector<8x128xf32> -> vector<8x128xf32>
    %113 = arith.addf %110, %112 : vector<8x128xf32>
    %114 = arith.negf %113 : vector<8x128xf32>
    %115 = math.exp %114 : vector<8x128xf32>
    %cst_40 = arith.constant 1.000000e+00 : f32
    %116 = vector.broadcast %cst_40 : f32 to vector<8x128xf32>
    %117 = arith.addf %116, %115 : vector<8x128xf32>
    %118 = arith.divf %116, %117 : vector<8x128xf32>
    %119 = vector.extract_strided_slice %118 {offsets = [0, 0], sizes = [8, 32], strides = [1, 1]} : vector<8x128xf32> to vector<8x32xf32>
    %120 = vector.extract_strided_slice %118 {offsets = [0, 32], sizes = [8, 32], strides = [1, 1]} : vector<8x128xf32> to vector<8x32xf32>
    %121 = vector.extract_strided_slice %118 {offsets = [0, 64], sizes = [8, 32], strides = [1, 1]} : vector<8x128xf32> to vector<8x32xf32>
    %122 = vector.extract_strided_slice %118 {offsets = [0, 96], sizes = [8, 32], strides = [1, 1]} : vector<8x128xf32> to vector<8x32xf32>
    %123 = arith.mulf %120, %104 : vector<8x32xf32>
    %cst_41 = arith.constant 2.000000e+00 : f32
    %124 = vector.broadcast %cst_41 : f32 to vector<8x32xf32>
    %125 = arith.mulf %124, %121 : vector<8x32xf32>
    %cst_42 = arith.constant 1.000000e+00 : f32
    %126 = vector.broadcast %cst_42 : f32 to vector<8x32xf32>
    %127 = arith.subf %125, %126 : vector<8x32xf32>
    %128 = arith.mulf %119, %127 : vector<8x32xf32>
    %129 = arith.addf %123, %128 : vector<8x32xf32>
    %130 = math.tanh %129 : vector<8x32xf32>
    %131 = arith.mulf %122, %130 : vector<8x32xf32>
    %c5_i32 = arith.constant 5 : i32
    %132 = arith.index_cast %c5_i32 : i32 to index
    %c0_43 = arith.constant 0 : index
    %c0_44 = arith.constant 0 : index
    %133 = vector.load %arg2[%132, %c0_43, %c0_44] : memref<8x8x16xf32, #tpu.memory_space<vmem>>, vector<1x8x16xf32>
    %134 = vector.shape_cast %133 : vector<1x8x16xf32> to vector<8x16xf32>
    %cst_45 = arith.constant dense<0.000000e+00> : vector<8x128xf32>
    %135 = tpu.matmul %134, %3, %cst_45 {dimension_numbers = #tpu.dot_dimension_numbers<[1], [0], [0], [1], [0, 0, 1, 1], [], []>} : vector<8x16xf32>, vector<16x128xf32>, vector<8x128xf32> -> vector<8x128xf32>
    %136 = arith.truncf %131 : vector<8x32xf32> to vector<8x32xbf16>
    %cst_46 = arith.constant dense<0.000000e+00> : vector<8x128xf32>
    %137 = tpu.matmul %136, %4, %cst_46 {dimension_numbers = #tpu.dot_dimension_numbers<[1], [0], [0], [1], [0, 0, 1, 1], [], []>} : vector<8x32xbf16>, vector<32x128xbf16>, vector<8x128xf32> -> vector<8x128xf32>
    %138 = arith.addf %135, %137 : vector<8x128xf32>
    %139 = arith.negf %138 : vector<8x128xf32>
    %140 = math.exp %139 : vector<8x128xf32>
    %cst_47 = arith.constant 1.000000e+00 : f32
    %141 = vector.broadcast %cst_47 : f32 to vector<8x128xf32>
    %142 = arith.addf %141, %140 : vector<8x128xf32>
    %143 = arith.divf %141, %142 : vector<8x128xf32>
    %144 = vector.extract_strided_slice %143 {offsets = [0, 0], sizes = [8, 32], strides = [1, 1]} : vector<8x128xf32> to vector<8x32xf32>
    %145 = vector.extract_strided_slice %143 {offsets = [0, 32], sizes = [8, 32], strides = [1, 1]} : vector<8x128xf32> to vector<8x32xf32>
    %146 = vector.extract_strided_slice %143 {offsets = [0, 64], sizes = [8, 32], strides = [1, 1]} : vector<8x128xf32> to vector<8x32xf32>
    %147 = vector.extract_strided_slice %143 {offsets = [0, 96], sizes = [8, 32], strides = [1, 1]} : vector<8x128xf32> to vector<8x32xf32>
    %148 = arith.mulf %145, %129 : vector<8x32xf32>
    %cst_48 = arith.constant 2.000000e+00 : f32
    %149 = vector.broadcast %cst_48 : f32 to vector<8x32xf32>
    %150 = arith.mulf %149, %146 : vector<8x32xf32>
    %cst_49 = arith.constant 1.000000e+00 : f32
    %151 = vector.broadcast %cst_49 : f32 to vector<8x32xf32>
    %152 = arith.subf %150, %151 : vector<8x32xf32>
    %153 = arith.mulf %144, %152 : vector<8x32xf32>
    %154 = arith.addf %148, %153 : vector<8x32xf32>
    %155 = math.tanh %154 : vector<8x32xf32>
    %156 = arith.mulf %147, %155 : vector<8x32xf32>
    %c6_i32 = arith.constant 6 : i32
    %157 = arith.index_cast %c6_i32 : i32 to index
    %c0_50 = arith.constant 0 : index
    %c0_51 = arith.constant 0 : index
    %158 = vector.load %arg2[%157, %c0_50, %c0_51] : memref<8x8x16xf32, #tpu.memory_space<vmem>>, vector<1x8x16xf32>
    %159 = vector.shape_cast %158 : vector<1x8x16xf32> to vector<8x16xf32>
    %cst_52 = arith.constant dense<0.000000e+00> : vector<8x128xf32>
    %160 = tpu.matmul %159, %3, %cst_52 {dimension_numbers = #tpu.dot_dimension_numbers<[1], [0], [0], [1], [0, 0, 1, 1], [], []>} : vector<8x16xf32>, vector<16x128xf32>, vector<8x128xf32> -> vector<8x128xf32>
    %161 = arith.truncf %156 : vector<8x32xf32> to vector<8x32xbf16>
    %cst_53 = arith.constant dense<0.000000e+00> : vector<8x128xf32>
    %162 = tpu.matmul %161, %4, %cst_53 {dimension_numbers = #tpu.dot_dimension_numbers<[1], [0], [0], [1], [0, 0, 1, 1], [], []>} : vector<8x32xbf16>, vector<32x128xbf16>, vector<8x128xf32> -> vector<8x128xf32>
    %163 = arith.addf %160, %162 : vector<8x128xf32>
    %164 = arith.negf %163 : vector<8x128xf32>
    %165 = math.exp %164 : vector<8x128xf32>
    %cst_54 = arith.constant 1.000000e+00 : f32
    %166 = vector.broadcast %cst_54 : f32 to vector<8x128xf32>
    %167 = arith.addf %166, %165 : vector<8x128xf32>
    %168 = arith.divf %166, %167 : vector<8x128xf32>
    %169 = vector.extract_strided_slice %168 {offsets = [0, 0], sizes = [8, 32], strides = [1, 1]} : vector<8x128xf32> to vector<8x32xf32>
    %170 = vector.extract_strided_slice %168 {offsets = [0, 32], sizes = [8, 32], strides = [1, 1]} : vector<8x128xf32> to vector<8x32xf32>
    %171 = vector.extract_strided_slice %168 {offsets = [0, 64], sizes = [8, 32], strides = [1, 1]} : vector<8x128xf32> to vector<8x32xf32>
    %172 = vector.extract_strided_slice %168 {offsets = [0, 96], sizes = [8, 32], strides = [1, 1]} : vector<8x128xf32> to vector<8x32xf32>
    %173 = arith.mulf %170, %154 : vector<8x32xf32>
    %cst_55 = arith.constant 2.000000e+00 : f32
    %174 = vector.broadcast %cst_55 : f32 to vector<8x32xf32>
    %175 = arith.mulf %174, %171 : vector<8x32xf32>
    %cst_56 = arith.constant 1.000000e+00 : f32
    %176 = vector.broadcast %cst_56 : f32 to vector<8x32xf32>
    %177 = arith.subf %175, %176 : vector<8x32xf32>
    %178 = arith.mulf %169, %177 : vector<8x32xf32>
    %179 = arith.addf %173, %178 : vector<8x32xf32>
    %180 = math.tanh %179 : vector<8x32xf32>
    %181 = arith.mulf %172, %180 : vector<8x32xf32>
    %c7_i32 = arith.constant 7 : i32
    %182 = arith.index_cast %c7_i32 : i32 to index
    %c0_57 = arith.constant 0 : index
    %c0_58 = arith.constant 0 : index
    %183 = vector.load %arg2[%182, %c0_57, %c0_58] : memref<8x8x16xf32, #tpu.memory_space<vmem>>, vector<1x8x16xf32>
    %184 = vector.shape_cast %183 : vector<1x8x16xf32> to vector<8x16xf32>
    %cst_59 = arith.constant dense<0.000000e+00> : vector<8x128xf32>
    %185 = tpu.matmul %184, %3, %cst_59 {dimension_numbers = #tpu.dot_dimension_numbers<[1], [0], [0], [1], [0, 0, 1, 1], [], []>} : vector<8x16xf32>, vector<16x128xf32>, vector<8x128xf32> -> vector<8x128xf32>
    %186 = arith.truncf %181 : vector<8x32xf32> to vector<8x32xbf16>
    %cst_60 = arith.constant dense<0.000000e+00> : vector<8x128xf32>
    %187 = tpu.matmul %186, %4, %cst_60 {dimension_numbers = #tpu.dot_dimension_numbers<[1], [0], [0], [1], [0, 0, 1, 1], [], []>} : vector<8x32xbf16>, vector<32x128xbf16>, vector<8x128xf32> -> vector<8x128xf32>
    %188 = arith.addf %185, %187 : vector<8x128xf32>
    %189 = arith.negf %188 : vector<8x128xf32>
    %190 = math.exp %189 : vector<8x128xf32>
    %cst_61 = arith.constant 1.000000e+00 : f32
    %191 = vector.broadcast %cst_61 : f32 to vector<8x128xf32>
    %192 = arith.addf %191, %190 : vector<8x128xf32>
    %193 = arith.divf %191, %192 : vector<8x128xf32>
    %194 = vector.extract_strided_slice %193 {offsets = [0, 0], sizes = [8, 32], strides = [1, 1]} : vector<8x128xf32> to vector<8x32xf32>
    %195 = vector.extract_strided_slice %193 {offsets = [0, 32], sizes = [8, 32], strides = [1, 1]} : vector<8x128xf32> to vector<8x32xf32>
    %196 = vector.extract_strided_slice %193 {offsets = [0, 64], sizes = [8, 32], strides = [1, 1]} : vector<8x128xf32> to vector<8x32xf32>
    %197 = vector.extract_strided_slice %193 {offsets = [0, 96], sizes = [8, 32], strides = [1, 1]} : vector<8x128xf32> to vector<8x32xf32>
    %198 = arith.mulf %195, %179 : vector<8x32xf32>
    %cst_62 = arith.constant 2.000000e+00 : f32
    %199 = vector.broadcast %cst_62 : f32 to vector<8x32xf32>
    %200 = arith.mulf %199, %196 : vector<8x32xf32>
    %cst_63 = arith.constant 1.000000e+00 : f32
    %201 = vector.broadcast %cst_63 : f32 to vector<8x32xf32>
    %202 = arith.subf %200, %201 : vector<8x32xf32>
    %203 = arith.mulf %194, %202 : vector<8x32xf32>
    %204 = arith.addf %198, %203 : vector<8x32xf32>
    %205 = math.tanh %204 : vector<8x32xf32>
    %206 = arith.mulf %197, %205 : vector<8x32xf32>
    %c8_i32 = arith.constant 8 : i32
    %c0_64 = arith.constant 0 : index
    %c0_65 = arith.constant 0 : index
    %207 = vector.load %arg5[%c0_64, %c0_65] : memref<8x32xf32, #tpu.memory_space<vmem>>, vector<8x32xf32>
    tpu.vector_store %arg5[%c0_64, %c0_65], %206 {strides = array<i32>} : memref<8x32xf32, #tpu.memory_space<vmem>>, vector<8x32xf32>,
    %c0_66 = arith.constant 0 : index
    %c0_67 = arith.constant 0 : index
    %208 = vector.load %arg6[%c0_66, %c0_67] : memref<8x32xf32, #tpu.memory_space<vmem>>, vector<8x32xf32>
    tpu.vector_store %arg6[%c0_66, %c0_67], %204 {strides = array<i32>} : memref<8x32xf32, #tpu.memory_space<vmem>>, vector<8x32xf32>,
    return
  }
  func.func @transform_0(%arg0: i32, %arg1: i32) -> (i32, i32, i32) {
    %c0_i32 = arith.constant 0 : i32
    %c0_i32_0 = arith.constant 0 : i32
    return %arg1, %arg0, %c0_i32 : i32, i32, i32
  }
  func.func @transform_1(%arg0: i32, %arg1: i32) -> (i32, i32) {
    %c0_i32 = arith.constant 0 : i32
    %c0_i32_0 = arith.constant 0 : i32
    %c0_i32_1 = arith.constant 0 : i32
    return %c0_i32, %c0_i32_0 : i32, i32
  }
  func.func @transform_2(%arg0: i32, %arg1: i32) -> (i32, i32) {
    %c0_i32 = arith.constant 0 : i32
    %c0_i32_0 = arith.constant 0 : i32
    %c0_i32_1 = arith.constant 0 : i32
    return %c0_i32, %c0_i32_0 : i32, i32
  }
  func.func @transform_3(%arg0: i32, %arg1: i32) -> (i32, i32) {
    %c0_i32 = arith.constant 0 : i32
    %c0_i32_0 = arith.constant 0 : i32
    return %arg0, %c0_i32 : i32, i32
  }
}

</mosaic_0001>

<bundles_post_ra>
// kernel: tpu_custom_call.1
= control target key start
LH: loop header
LB: loop body
LE: loop exit
PB: predicated region body
PF: predicated region fallthrough
CT: control target
= control target key end

     0   :  { %8 = vsyncpa [#allocation4], 0  ;;  %s1902_s0 = inlined_call_operand.hbm [shape: f32[8,8,16], index: 0, kind: input, shape index: {}]   ;;  %s1903_s1 = inlined_call_operand.hbm [shape: f32[16,128], index: 1, kind: input, shape index: {}]   ;;  %s1904_s2 = inlined_call_operand.hbm [shape: bf16[32,128], index: 2, kind: input, shape index: {}]   ;;  %s1905_s3 = inlined_call_operand.hbm [shape: f32[8,32], index: 3, kind: output, shape index: {}]  }
   0x1   :  { %9 = vsyncpa [#allocation7], 0 }
   0x2   :  { %10 = vsyncpa [#allocation5], 0  ;;  %s1671_s12 = smov [#allocation6]   ;;  %s1672_s14 = smov [#allocation3]  }
   0x3   :  { %s28_s13 = sshll.u32 %s1671_s12, 4  ;;  %s16_s15 = sshll.u32 %s1672_s14, 4  ;;  %s29_s13 = int_to_ptr.vmem [resolvable:$true] %s28_s13  ;;  %s1704_s15 = int_to_ptr.vmem [resolvable:$true] %s16_s15 }
   0x4   :  { %s1577_s18 = scalar_lea.hbm %s1903_s1, 256 }
   0x5   :  { %p1578_p0 = scmp.ne.s32.totalorder %s1903_s1, %s1577_s18  ;;  %p1581_p1 = scmp.lt.u32.totalorder %s1577_s18, %s1903_s1 }
   0x7   :  { %p1583_p2 = pnand %p1581_p1, %p1578_p0 }
   0x9   :  { %1586 = shalt.err (!%p1583_p2)
}
   0xa   :  { %s1587_s23 = scalar_lea.vmem %s29_s13, 256  ;;  %p1592_p4 = scmp.lt.s32.totalorder %s29_s13, %s29_s13 }
   0xb   :  { %p1588_p3 = scmp.ne.s32.totalorder %s29_s13, %s1587_s23  ;;  %p1593_p5 = scmp.lt.s32.totalorder %s1587_s23, %s1587_s23 }
   0xd   :  { %p1594_p6 = por %p1593_p5, %p1592_p4 }
   0xf   :  { %p1595_p7 = pnand %p1594_p6, %p1588_p3 }
  0x11   :  { %1598 = shalt.err (!%p1595_p7)
}
  0x12   :  { %s1673_s24 = smov 128   ;;  %s1674_s25 = smov 8  }
  0x13   :  { %34 = dma.hbm_to_vmem [thread:$0]  %s1903_s1, 256, %s29_s13, [#allocation7], %s1673_s24, %s1673_s24, %s1674_s25  }
  0x14   :  { %s1599_s30 = scalar_lea.hbm %s1902_s0, 1024 }
  0x15   :  { %p1600_p8 = scmp.ne.s32.totalorder %s1902_s0, %s1599_s30  ;;  %p1603_p9 = scmp.lt.u32.totalorder %s1599_s30, %s1902_s0 }
  0x17   :  { %p1605_p10 = pnand %p1603_p9, %p1600_p8 }
  0x19   :  { %1608 = shalt.err (!%p1605_p10)
}
  0x1a   :  { %s1609_s8 = scalar_lea.vmem %s1704_s15, 1024  ;;  %p1614_p12 = scmp.lt.s32.totalorder %s1704_s15, %s1704_s15 }
  0x1b   :  { %p1610_p11 = scmp.ne.s32.totalorder %s1704_s15, %s1609_s8  ;;  %p1615_p13 = scmp.lt.s32.totalorder %s1609_s8, %s1609_s8 }
  0x1d   :  { %p1616_p0 = por %p1615_p13, %p1614_p12 }
  0x1f   :  { %p1617_p1 = pnand %p1616_p0, %p1610_p11 }
  0x21   :  { %1620 = shalt.err (!%p1617_p1)
}
  0x22   :  { %22 = dma.hbm_to_vmem [thread:$0]  %s1902_s0, 1024, %s1704_s15, [#allocation4], %s1673_s24, %s1673_s24, %s1674_s25  }
  0x23   :  { %s1675_s10 = smov [#allocation8]   ;;  %s1621_s14 = scalar_lea.hbm %s1904_s2, 256 }
  0x24   :  { %s40_s11 = sshll.u32 %s1675_s10, 4  ;;  %p1622_p2 = scmp.ne.s32.totalorder %s1904_s2, %s1621_s14  ;;  %s41_s11 = int_to_ptr.vmem [resolvable:$true] %s40_s11 }
  0x25   :  { %p1625_p3 = scmp.lt.u32.totalorder %s1621_s14, %s1904_s2 }
  0x27   :  { %p1627_p4 = pnand %p1625_p3, %p1622_p2 }
  0x29   :  { %1630 = shalt.err (!%p1627_p4)
}
  0x2a   :  { %s1631_s20 = scalar_lea.vmem %s41_s11, 256  ;;  %p1636_p6 = scmp.lt.s32.totalorder %s41_s11, %s41_s11 }
  0x2b   :  { %p1632_p5 = scmp.ne.s32.totalorder %s41_s11, %s1631_s20  ;;  %p1637_p7 = scmp.lt.s32.totalorder %s1631_s20, %s1631_s20 }
  0x2d   :  { %p1638_p8 = por %p1637_p7, %p1636_p6 }
  0x2f   :  { %p1639_p9 = pnand %p1638_p8, %p1632_p5 }
  0x31   :  { %1642 = shalt.err (!%p1639_p9)
}
  0x32   :  { %s1676_s0 = smov 64   ;;  %s1677_s15 = smov 4  }
  0x33   :  { %46 = dma.hbm_to_vmem [thread:$0]  %s1904_s2, 256, %s41_s11, [#allocation7], %s1676_s0, %s1676_s0, %s1677_s15  }
  0x34   :  { %1665 = dma.done.wait [#allocation4], 1024  }
  0x35   :  { %1666 = vsyncadd [#allocation4], 4294966272 }
  0x36   :  { %1667 = dma.done.wait [#allocation7], 512  }
  0x37   :  { %1668 = vsyncadd [#allocation7], 4294966784  ;;  %v1678_v0 = vmov 0.0   ;;  %v1679_v1 = vmov 0.0|0.0   ;;  %vm61_vm0 = vcmask 261120   ;;  %vm1680_vm1 = vmmov 0  }
  0x38   :  { %1370 = vmatprep.subr.bf16.mxu0 %v1678_v0  ;;  %1490 = vmatprep.subr.bf16.mxu1 %v1679_v1  ;;  %62 = vst.msk [vmem:[#allocation9] sm:$0xff] %vm61_vm0, %v1678_v0  ;;  %63 = vst.msk [vmem:[#allocation2] sm:$0xff] %vm61_vm0, %v1678_v0  ;;  %v1759_v2 = vld [vmem:[#allocation8] sm:$0xff]   ;;  %v64_v3 = vld [vmem:[#allocation6] sm:$0xff]  ;;  %vm130_vm2 = vcmask 130048   ;;  %s1681_s2 = smov 32  }
  0x39   :  { %1382 = vmatprep.mubr.msk.f32.mxu1 %vm1680_vm1, %v1678_v0  ;;  %1374 = vmatprep.mubr.msk.bf16.mxu0 %vm1680_vm1, %v1678_v0  ;;  %v65_v4 = vld [vmem:[#allocation6 + $0x8] sm:$0xff]  ;;  %v1764_v6 = vld [vmem:[#allocation8 + $0x8] sm:$0xff]   ;;  %v72_v8 = vld [vmem:[#allocation3] sm:$0xff]  ;;  %s1682_s23 = smov 96   ;;  %s1683_s24 = smov [#allocation9]  }
  0x3a   :  { %1371 = vmatpush3.bf16.msra.mxu0 %v1759_v2  ;;  %v1762_v5 = vpack.c.bf16 %v65_v4, %v64_v3  ;;  %v234_v30 = vld [vmem:[#allocation3 + $0x8] sm:$0xff]  ;;  %v381_v54 = vld [vmem:[#allocation3 + $0x10] sm:$0xff]  ;;  %s1278_s25 = sshll.u32 %s1683_s24, 4  ;;  %s1279_s25 = int_to_ptr.vmem [resolvable:$true] %s1278_s25 }
  0x3b   :  { %1372 = vmatprep.subr.bf16.mxu0 %v1678_v0  ;;  %s1643_s26 = scalar_lea.vmem %s1279_s25, 128  ;;  %p1648_p11 = scmp.lt.s32.totalorder %s1279_s25, %s1279_s25 }
  0x3c   :  { %1492 = vmatpush3.bf16.msra.mxu1 %v1762_v5  ;;  %p1644_p10 = scmp.ne.s32.totalorder %s1279_s25, %s1643_s26  ;;  %p1649_p12 = scmp.lt.s32.totalorder %s1643_s26, %s1643_s26 }
  0x3d   :  { %1385 = vmatprep.subr.bf16.mxu1 %v1678_v0 }
  0x3e   :  { %1373 = vmatpush3.bf16.msra.mxu0 %v1764_v6  ;;  %p1650_p13 = por %p1649_p12, %p1648_p11 }
  0x3f   :  { %v70_v7 = vld [vmem:[#allocation9] sm:$0xff]  ;;  %1383 = vmatmul.mubr.msk.f32.vlgmr.msra.gmra.mrb[0].mxu1 %vm130_vm2, %v72_v8  ;;  %1493 = vmatprep.subr.bf16.mxu0 %v1679_v1  ;;  %v71_v23 = vld [vmem:[#allocation2] sm:$0xff] }
  0x40   :  { %v73_v9 = vpack.c.bf16 %v70_v7, %v70_v7  ;;  %1386 = vmatpush3.bf16.msra.mxu1 %v1759_v2  ;;  %1389 = vmatprep.mubr.msk.bf16.mxu1 %vm1680_vm1, %v1678_v0  ;;  %p1651_p0 = pnand %p1650_p13, %p1644_p10 }
  0x41   :  { %1387 = vmatprep.subr.bf16.mxu1 %v1678_v0 }
  0x42   :  { %1375 = vmatmul.mubr.msk.bf16.vlgmr.msra.gmra.mrb[0].mxu0 %vm61_vm0, %v73_v9 }
  0x43   :  { %1495 = vmatpush3.bf16.msra.mxu0 %v1762_v5  ;;  %1397 = vmatprep.mubr.msk.f32.mxu0 %vm1680_vm1, %v1678_v0 }
  0x44   :  { %1496 = vmatprep.subr.bf16.mxu0 %v1679_v1  ;;  %1388 = vmatpush3.bf16.msra.mxu1 %v1764_v6 }
  0x45   :  { %1400 = vmatprep.subr.bf16.mxu1 %v1678_v0 }
  0x4a   :  { %1398 = vmatmul.mubr.msk.f32.vlgmr.msra.gmra.mrb[4].mxu0 %vm130_vm2, %v234_v30 }
  0x4b   :  { %1498 = vmatpush3.bf16.msra.mxu0 %v1762_v5  ;;  %1412 = vmatprep.mubr.msk.f32.mxu0 %vm1680_vm1, %v1678_v0 }
  0x4c   :  { %1415 = vmatprep.subr.bf16.mxu0 %v1678_v0 }
  0x4e   :  { %1413 = vmatmul.mubr.msk.f32.vlgmr.msra.gmra.mrb[6].mxu0 %vm130_vm2, %v381_v54 }
  0x4f   :  { %1416 = vmatpush3.bf16.msra.mxu0 %v1759_v2  ;;  %1419 = vmatprep.mubr.msk.bf16.mxu0 %vm1680_vm1, %v1678_v0 }
  0x50   :  { %1417 = vmatprep.subr.bf16.mxu0 %v1678_v0 }
  0x53   :  { %1418 = vmatpush3.bf16.msra.mxu0 %v1764_v6 }
  0x54   :  { %1430 = vmatprep.subr.bf16.mxu0 %v1678_v0 }
 0x112   :  { %v200_v10 = vpop.f32.mrb[0].mxu1 }
 0x113   :  { %v1384_v11 = vpop.f32.mrb[1].mxu1 }
 0x115   :  { %v124_v12 = vpop.f32.mrb[0].mxu0 }
 0x116   :  { %v201_v13 = vadd.f32 %v200_v10, %v124_v12  ;;  %v1376_v14 = vpop.f32.mrb[1].mxu0 }
 0x117   :  { %v127_v15 = vpop.f32.mrb[2].mxu0 }
 0x118   :  { %v1292_v16 = vmul.f32 -1.442695, %v201_v13  ;;  %v1377_v17 = vpop.f32.mrb[3].mxu0 }
 0x11a   :  { %1529 = vpow2.f32 %v1292_v16 }
 0x11d   :  { %v351_v35 = vpop.f32.mrb[4].mxu0 }
 0x11e   :  { %v1399_v36 = vpop.f32.mrb[5].mxu0 }
 0x121   :  { %v498_v59 = vpop.f32.mrb[6].mxu0 }
 0x122   :  { %v1414_v60 = vpop.f32.mrb[7].mxu0 }
 0x124   :  { %v1530_v18 = vpop.eup %1529 }
 0x125   :  { %v207_v19 = vadd.f32 1.0, %v1530_v18 }
 0x127   :  { %1531 = vrcp.f32 %v207_v19  ;;  %v528_v19 = vld [vmem:[#allocation3 + $0x18] sm:$0xff] }
 0x131   :  { %v1532_v20 = vpop.eup %1531 }
 0x132   :  { %v215_v21 = vmul.f32 2.0, %v1532_v20 }
 0x134   :  { %v1293_v22 = vadd.f32 -1.0, %v215_v21 }
 0x136   :  { %218 = vrot.lane.b32.xlu0 %v1293_v22, %s1676_s0 }
 0x13a   :  { %211 = vrot.lane.b32.xlu0 %v71_v23, %s1681_s2 }
 0x1a8   :  { %v219_v24 = vpop.permute.xlu0 %218 }
 0x1a9   :  { %v221_v25 = vmul.f32 %v1532_v20, %v219_v24 }
 0x1ab   :  { %223 = vrot.lane.b32.xlu1 %v221_v25, %s1681_s2 }
 0x1ac   :  { %v212_v26 = vpop.permute.xlu0 %211 }
 0x1ad   :  { %v214_v27 = vmul.f32 %v1532_v20, %v212_v26 }
 0x21d   :  { %v224_v28 = vpop.permute.xlu1 %223 }
 0x21e   :  { %v226_v29 = vadd.f32 %v224_v28, %v214_v27 }
 0x220   :  { %1533 = vtanh.f32 %v226_v29 }
 0x22a   :  { %v1534_v31 = vpop.eup %1533 }
 0x22b   :  { %229 = vrot.lane.b32.xlu1 %v1534_v31, %s1676_s0 }
 0x29d   :  { %v230_v32 = vpop.permute.xlu1 %229 }
 0x29e   :  { %v232_v33 = vmul.f32 %v1532_v20, %v230_v32 }
 0x2a0   :  { %v235_v34 = vpack.c.bf16 %v232_v33, %v232_v33 }
 0x2a2   :  { %237 = vrot.lane.b32.xlu0 %v235_v34, %s1681_s2 }
 0x314   :  { %v238_v37 = vpop.permute.xlu0 %237 }
 0x315   :  { %1390 = vmatmul.mubr.msk.bf16.vlgmr.msra.gmra.mrb[4].mxu1 %vm61_vm0, %v238_v37 }
 0x316   :  { %1401 = vmatpush3.bf16.msra.mxu1 %v1759_v2  ;;  %1404 = vmatprep.mubr.msk.bf16.mxu1 %vm1680_vm1, %v1678_v0 }
 0x317   :  { %1402 = vmatprep.subr.bf16.mxu1 %v1678_v0 }
 0x31a   :  { %1403 = vmatpush3.bf16.msra.mxu1 %v1764_v6 }
 0x31b   :  { %1499 = vmatprep.subr.bf16.mxu1 %v1679_v1 }
 0x3e8   :  { %v276_v38 = vpop.f32.mrb[4].mxu1 }
 0x3e9   :  { %v352_v39 = vadd.f32 %v351_v35, %v276_v38  ;;  %v1391_v40 = vpop.f32.mrb[5].mxu1 }
 0x3ea   :  { %v279_v41 = vpop.f32.mrb[6].mxu1 }
 0x3eb   :  { %v1296_v42 = vmul.f32 -1.442695, %v352_v39  ;;  %v1392_v43 = vpop.f32.mrb[7].mxu1 }
 0x3ec   :  { %v675_v43 = vld [vmem:[#allocation3 + $0x20] sm:$0xff] }
 0x3ed   :  { %1535 = vpow2.f32 %v1296_v42 }
 0x3f7   :  { %v1536_v44 = vpop.eup %1535 }
 0x3f8   :  { %v358_v45 = vadd.f32 1.0, %v1536_v44 }
 0x3fa   :  { %1537 = vrcp.f32 %v358_v45 }
 0x404   :  { %v1538_v46 = vpop.eup %1537 }
 0x405   :  { %v362_v47 = vmul.f32 2.0, %v1538_v46  ;;  %v361_v51 = vmul.f32 %v1538_v46, %v226_v29 }
 0x407   :  { %v1297_v48 = vadd.f32 -1.0, %v362_v47 }
 0x409   :  { %365 = vrot.lane.b32.xlu1 %v1297_v48, %s1676_s0 }
 0x47b   :  { %v366_v49 = vpop.permute.xlu1 %365 }
 0x47c   :  { %v368_v50 = vmul.f32 %v1538_v46, %v366_v49 }
 0x47e   :  { %370 = vrot.lane.b32.xlu0 %v368_v50, %s1681_s2 }
 0x4f0   :  { %v371_v52 = vpop.permute.xlu0 %370 }
 0x4f1   :  { %v373_v53 = vadd.f32 %v371_v52, %v361_v51 }
 0x4f3   :  { %1539 = vtanh.f32 %v373_v53 }
 0x4fd   :  { %v1540_v55 = vpop.eup %1539 }
 0x4fe   :  { %376 = vrot.lane.b32.xlu1 %v1540_v55, %s1676_s0 }
 0x570   :  { %v377_v56 = vpop.permute.xlu1 %376 }
 0x571   :  { %v379_v57 = vmul.f32 %v1538_v46, %v377_v56 }
 0x573   :  { %v382_v58 = vpack.c.bf16 %v379_v57, %v379_v57 }
 0x575   :  { %384 = vrot.lane.b32.xlu0 %v382_v58, %s1681_s2 }
 0x5e7   :  { %v385_v61 = vpop.permute.xlu0 %384 }
 0x5e8   :  { %1405 = vmatmul.mubr.msk.bf16.vlgmr.msra.gmra.mrb[8].mxu1 %vm61_vm0, %v385_v61 }
 0x5e9   :  { %1501 = vmatpush3.bf16.msra.mxu1 %v1762_v5  ;;  %1427 = vmatprep.mubr.msk.f32.mxu1 %vm1680_vm1, %v1678_v0 }
 0x5ea   :  { %1502 = vmatprep.subr.bf16.mxu1 %v1679_v1 }
 0x5f0   :  { %1428 = vmatmul.mubr.msk.f32.vlgmr.msra.gmra.mrb[2].mxu1 %vm130_vm2, %v528_v19 }
 0x5f1   :  { %1504 = vmatpush3.bf16.msra.mxu1 %v1762_v5  ;;  %1442 = vmatprep.mubr.msk.f32.mxu1 %vm1680_vm1, %v1678_v0 }
 0x5f2   :  { %1445 = vmatprep.subr.bf16.mxu1 %v1678_v0 }
 0x5f4   :  { %1443 = vmatmul.mubr.msk.f32.vlgmr.msra.gmra.mrb[12].mxu1 %vm130_vm2, %v675_v43 }
 0x5f5   :  { %1446 = vmatpush3.bf16.msra.mxu1 %v1759_v2  ;;  %1449 = vmatprep.mubr.msk.bf16.mxu1 %vm1680_vm1, %v1678_v0 }
 0x5f6   :  { %1447 = vmatprep.subr.bf16.mxu1 %v1678_v0 }
 0x5f9   :  { %1448 = vmatpush3.bf16.msra.mxu1 %v1764_v6 }
 0x5fa   :  { %1460 = vmatprep.subr.bf16.mxu1 %v1678_v0 }
 0x6bb   :  { %v423_v62 = vpop.f32.mrb[8].mxu1 }
 0x6bc   :  { %v499_v63 = vadd.f32 %v498_v59, %v423_v62  ;;  %v1406_v3 = vpop.f32.mrb[9].mxu1 }
 0x6bd   :  { %v426_v4 = vpop.f32.mrb[10].mxu1 }
 0x6be   :  { %v1300_v7 = vmul.f32 -1.442695, %v499_v63  ;;  %v1407_v8 = vpop.f32.mrb[11].mxu1 }
 0x6bf   :  { %v822_v8 = vld [vmem:[#allocation3 + $0x28] sm:$0xff] }
 0x6c0   :  { %1541 = vpow2.f32 %v1300_v7 }
 0x6c3   :  { %v645_v24 = vpop.f32.mrb[2].mxu1 }
 0x6c4   :  { %v1429_v25 = vpop.f32.mrb[3].mxu1 }
 0x6c7   :  { %v792_v48 = vpop.f32.mrb[12].mxu1 }
 0x6c8   :  { %v1444_v49 = vpop.f32.mrb[13].mxu1 }
 0x6ca   :  { %v1542_v9 = vpop.eup %1541 }
 0x6cb   :  { %v505_v10 = vadd.f32 1.0, %v1542_v9 }
 0x6cd   :  { %1543 = vrcp.f32 %v505_v10 }
 0x6d7   :  { %v1544_v11 = vpop.eup %1543 }
 0x6d8   :  { %v509_v12 = vmul.f32 2.0, %v1544_v11  ;;  %v508_v16 = vmul.f32 %v1544_v11, %v373_v53 }
 0x6da   :  { %v1301_v13 = vadd.f32 -1.0, %v509_v12 }
 0x6dc   :  { %512 = vrot.lane.b32.xlu1 %v1301_v13, %s1676_s0 }
 0x74e   :  { %v513_v14 = vpop.permute.xlu1 %512 }
 0x74f   :  { %v515_v15 = vmul.f32 %v1544_v11, %v513_v14 }
 0x751   :  { %517 = vrot.lane.b32.xlu0 %v515_v15, %s1681_s2 }
 0x7c3   :  { %v518_v17 = vpop.permute.xlu0 %517 }
 0x7c4   :  { %v520_v18 = vadd.f32 %v518_v17, %v508_v16 }
 0x7c6   :  { %1545 = vtanh.f32 %v520_v18 }
 0x7d0   :  { %v1546_v20 = vpop.eup %1545 }
 0x7d1   :  { %523 = vrot.lane.b32.xlu1 %v1546_v20, %s1676_s0 }
 0x843   :  { %v524_v21 = vpop.permute.xlu1 %523 }
 0x844   :  { %v526_v22 = vmul.f32 %v1544_v11, %v524_v21 }
 0x846   :  { %v529_v23 = vpack.c.bf16 %v526_v22, %v526_v22 }
 0x848   :  { %531 = vrot.lane.b32.xlu0 %v529_v23, %s1681_s2 }
 0x8ba   :  { %v532_v26 = vpop.permute.xlu0 %531 }
 0x8bb   :  { %1420 = vmatmul.mubr.msk.bf16.vlgmr.msra.gmra.mrb[8].mxu0 %vm61_vm0, %v532_v26 }
 0x8bc   :  { %1431 = vmatpush3.bf16.msra.mxu0 %v1759_v2  ;;  %1434 = vmatprep.mubr.msk.bf16.mxu0 %vm1680_vm1, %v1678_v0 }
 0x8bd   :  { %1432 = vmatprep.subr.bf16.mxu0 %v1678_v0 }
 0x8c0   :  { %1433 = vmatpush3.bf16.msra.mxu0 %v1764_v6 }
 0x8c1   :  { %1505 = vmatprep.subr.bf16.mxu0 %v1679_v1 }
 0x98e   :  { %v570_v27 = vpop.f32.mrb[8].mxu0 }
 0x98f   :  { %v646_v28 = vadd.f32 %v645_v24, %v570_v27  ;;  %v1421_v29 = vpop.f32.mrb[9].mxu0 }
 0x990   :  { %v573_v30 = vpop.f32.mrb[10].mxu0 }
 0x991   :  { %v1304_v31 = vmul.f32 -1.442695, %v646_v28  ;;  %v1422_v32 = vpop.f32.mrb[11].mxu0 }
 0x993   :  { %1547 = vpow2.f32 %v1304_v31  ;;  %v969_v31 = vld [vmem:[#allocation3 + $0x30] sm:$0xff] }
 0x99d   :  { %v1548_v33 = vpop.eup %1547 }
 0x99e   :  { %v652_v34 = vadd.f32 1.0, %v1548_v33 }
 0x9a0   :  { %1549 = vrcp.f32 %v652_v34 }
 0x9aa   :  { %v1550_v35 = vpop.eup %1549 }
 0x9ab   :  { %v656_v36 = vmul.f32 2.0, %v1550_v35  ;;  %v655_v40 = vmul.f32 %v1550_v35, %v520_v18 }
 0x9ad   :  { %v1305_v37 = vadd.f32 -1.0, %v656_v36 }
 0x9af   :  { %659 = vrot.lane.b32.xlu1 %v1305_v37, %s1676_s0 }
 0xa21   :  { %v660_v38 = vpop.permute.xlu1 %659 }
 0xa22   :  { %v662_v39 = vmul.f32 %v1550_v35, %v660_v38 }
 0xa24   :  { %664 = vrot.lane.b32.xlu0 %v662_v39, %s1681_s2 }
 0xa96   :  { %v665_v41 = vpop.permute.xlu0 %664 }
 0xa97   :  { %v667_v42 = vadd.f32 %v665_v41, %v655_v40 }
 0xa99   :  { %1551 = vtanh.f32 %v667_v42 }
 0xaa3   :  { %v1552_v44 = vpop.eup %1551 }
 0xaa4   :  { %670 = vrot.lane.b32.xlu1 %v1552_v44, %s1676_s0 }
 0xb16   :  { %v671_v45 = vpop.permute.xlu1 %670 }
 0xb17   :  { %v673_v46 = vmul.f32 %v1550_v35, %v671_v45 }
 0xb19   :  { %v676_v47 = vpack.c.bf16 %v673_v46, %v673_v46 }
 0xb1b   :  { %678 = vrot.lane.b32.xlu0 %v676_v47, %s1681_s2 }
 0xb8d   :  { %v679_v50 = vpop.permute.xlu0 %678 }
 0xb8e   :  { %1435 = vmatmul.mubr.msk.bf16.vlgmr.msra.gmra.mrb[12].mxu0 %vm61_vm0, %v679_v50 }
 0xb8f   :  { %1507 = vmatpush3.bf16.msra.mxu0 %v1762_v5  ;;  %1457 = vmatprep.mubr.msk.f32.mxu0 %vm1680_vm1, %v1678_v0 }
 0xb90   :  { %1508 = vmatprep.subr.bf16.mxu0 %v1679_v1 }
 0xb96   :  { %1458 = vmatmul.mubr.msk.f32.vlgmr.msra.gmra.mrb[16].mxu0 %vm130_vm2, %v822_v8 }
 0xb97   :  { %1510 = vmatpush3.bf16.msra.mxu0 %v1762_v5  ;;  %1472 = vmatprep.mubr.msk.f32.mxu0 %vm1680_vm1, %v1678_v0 }
 0xb98   :  { %1475 = vmatprep.subr.bf16.mxu0 %v1678_v0 }
 0xb9a   :  { %1473 = vmatmul.mubr.msk.f32.vlgmr.msra.gmra.mrb[18].mxu0 %vm130_vm2, %v969_v31 }
 0xb9b   :  { %1476 = vmatpush3.bf16.msra.mxu0 %v1759_v2  ;;  %1479 = vmatprep.mubr.msk.bf16.mxu0 %vm1680_vm1, %v1678_v0 }
 0xb9c   :  { %1477 = vmatprep.subr.bf16.mxu0 %v1678_v0 }
 0xb9f   :  { %1478 = vmatpush3.bf16.msra.mxu0 %v1764_v6 }
 0xc61   :  { %v717_v51 = vpop.f32.mrb[12].mxu0 }
 0xc62   :  { %v793_v52 = vadd.f32 %v792_v48, %v717_v51  ;;  %v1436_v53 = vpop.f32.mrb[13].mxu0  ;;  %v1116_v51 = vld [vmem:[#allocation3 + $0x38] sm:$0xff] }
 0xc63   :  { %v720_v54 = vpop.f32.mrb[14].mxu0 }
 0xc64   :  { %v1308_v55 = vmul.f32 -1.442695, %v793_v52  ;;  %v1437_v56 = vpop.f32.mrb[15].mxu0 }
 0xc66   :  { %1553 = vpow2.f32 %v1308_v55 }
 0xc69   :  { %v939_v13 = vpop.f32.mrb[16].mxu0 }
 0xc6a   :  { %v1459_v14 = vpop.f32.mrb[17].mxu0 }
 0xc6d   :  { %v1086_v36 = vpop.f32.mrb[18].mxu0 }
 0xc6e   :  { %v1474_v37 = vpop.f32.mrb[19].mxu0 }
 0xc70   :  { %v1554_v57 = vpop.eup %1553 }
 0xc71   :  { %v799_v58 = vadd.f32 1.0, %v1554_v57 }
 0xc73   :  { %1555 = vrcp.f32 %v799_v58 }
 0xc7d   :  { %v1556_v59 = vpop.eup %1555 }
 0xc7e   :  { %v803_v60 = vmul.f32 2.0, %v1556_v59  ;;  %v802_v3 = vmul.f32 %v1556_v59, %v667_v42 }
 0xc80   :  { %v1309_v61 = vadd.f32 -1.0, %v803_v60 }
 0xc82   :  { %806 = vrot.lane.b32.xlu1 %v1309_v61, %s1676_s0 }
 0xcf4   :  { %v807_v62 = vpop.permute.xlu1 %806 }
 0xcf5   :  { %v809_v63 = vmul.f32 %v1556_v59, %v807_v62 }
 0xcf7   :  { %811 = vrot.lane.b32.xlu0 %v809_v63, %s1681_s2 }
 0xd69   :  { %v812_v4 = vpop.permute.xlu0 %811 }
 0xd6a   :  { %v814_v7 = vadd.f32 %v812_v4, %v802_v3 }
 0xd6c   :  { %1557 = vtanh.f32 %v814_v7 }
 0xd76   :  { %v1558_v9 = vpop.eup %1557 }
 0xd77   :  { %817 = vrot.lane.b32.xlu1 %v1558_v9, %s1676_s0 }
 0xde9   :  { %v818_v10 = vpop.permute.xlu1 %817 }
 0xdea   :  { %v820_v11 = vmul.f32 %v1556_v59, %v818_v10 }
 0xdec   :  { %v823_v12 = vpack.c.bf16 %v820_v11, %v820_v11 }
 0xdee   :  { %825 = vrot.lane.b32.xlu0 %v823_v12, %s1681_s2 }
 0xe60   :  { %v826_v15 = vpop.permute.xlu0 %825 }
 0xe61   :  { %1450 = vmatmul.mubr.msk.bf16.vlgmr.msra.gmra.mrb[16].mxu1 %vm61_vm0, %v826_v15 }
 0xe62   :  { %1461 = vmatpush3.bf16.msra.mxu1 %v1759_v2  ;;  %1464 = vmatprep.mubr.msk.bf16.mxu1 %vm1680_vm1, %v1678_v0 }
 0xe63   :  { %1462 = vmatprep.subr.bf16.mxu1 %v1678_v0 }
 0xe66   :  { %1463 = vmatpush3.bf16.msra.mxu1 %v1764_v6 }
 0xe67   :  { %1511 = vmatprep.subr.bf16.mxu1 %v1679_v1 }
 0xf34   :  { %v864_v16 = vpop.f32.mrb[16].mxu1 }
 0xf35   :  { %v940_v17 = vadd.f32 %v939_v13, %v864_v16  ;;  %v1451_v18 = vpop.f32.mrb[17].mxu1 }
 0xf36   :  { %v867_v19 = vpop.f32.mrb[18].mxu1 }
 0xf37   :  { %v1312_v20 = vmul.f32 -1.442695, %v940_v17  ;;  %v1452_v21 = vpop.f32.mrb[19].mxu1 }
 0xf39   :  { %1559 = vpow2.f32 %v1312_v20 }
 0xf43   :  { %v1560_v22 = vpop.eup %1559 }
 0xf44   :  { %v946_v23 = vadd.f32 1.0, %v1560_v22 }
 0xf46   :  { %1561 = vrcp.f32 %v946_v23 }
 0xf50   :  { %v1562_v24 = vpop.eup %1561 }
 0xf51   :  { %v950_v25 = vmul.f32 2.0, %v1562_v24  ;;  %v949_v1 = vmul.f32 %v1562_v24, %v814_v7 }
 0xf53   :  { %v1313_v26 = vadd.f32 -1.0, %v950_v25 }
 0xf55   :  { %953 = vrot.lane.b32.xlu1 %v1313_v26, %s1676_s0 }
 0xfc7   :  { %v954_v27 = vpop.permute.xlu1 %953 }
 0xfc8   :  { %v956_v28 = vmul.f32 %v1562_v24, %v954_v27 }
 0xfca   :  { %958 = vrot.lane.b32.xlu0 %v956_v28, %s1681_s2 }
0x103c   :  { %v959_v29 = vpop.permute.xlu0 %958 }
0x103d   :  { %v961_v30 = vadd.f32 %v959_v29, %v949_v1 }
0x103f   :  { %1563 = vtanh.f32 %v961_v30 }
0x1049   :  { %v1564_v32 = vpop.eup %1563 }
0x104a   :  { %964 = vrot.lane.b32.xlu1 %v1564_v32, %s1676_s0 }
0x10bc   :  { %v965_v33 = vpop.permute.xlu1 %964 }
0x10bd   :  { %v967_v34 = vmul.f32 %v1562_v24, %v965_v33 }
0x10bf   :  { %v970_v35 = vpack.c.bf16 %v967_v34, %v967_v34 }
0x10c1   :  { %972 = vrot.lane.b32.xlu0 %v970_v35, %s1681_s2 }
0x1133   :  { %v973_v38 = vpop.permute.xlu0 %972 }
0x1134   :  { %1465 = vmatmul.mubr.msk.bf16.vlgmr.msra.gmra.mrb[20].mxu1 %vm61_vm0, %v973_v38 }
0x1135   :  { %1513 = vmatpush3.bf16.msra.mxu1 %v1762_v5  ;;  %1487 = vmatprep.mubr.msk.f32.mxu1 %vm1680_vm1, %v1678_v0 }
0x113c   :  { %1488 = vmatmul.mubr.msk.f32.vlgmr.msra.gmra.mrb[14].mxu1 %vm130_vm2, %v1116_v51 }
0x1207   :  { %v1011_v2 = vpop.f32.mrb[20].mxu1 }
0x1208   :  { %v1087_v6 = vadd.f32 %v1086_v36, %v1011_v2  ;;  %v1466_v39 = vpop.f32.mrb[21].mxu1 }
0x1209   :  { %v1014_v40 = vpop.f32.mrb[22].mxu1 }
0x120a   :  { %v1316_v41 = vmul.f32 -1.442695, %v1087_v6  ;;  %v1467_v42 = vpop.f32.mrb[23].mxu1 }
0x120c   :  { %1565 = vpow2.f32 %v1316_v41 }
0x120f   :  { %v1233_v56 = vpop.f32.mrb[14].mxu1 }
0x1210   :  { %v1489_v57 = vpop.f32.mrb[15].mxu1 }
0x1216   :  { %v1566_v43 = vpop.eup %1565 }
0x1217   :  { %v1093_v44 = vadd.f32 1.0, %v1566_v43 }
0x1219   :  { %1567 = vrcp.f32 %v1093_v44 }
0x1223   :  { %v1568_v45 = vpop.eup %1567 }
0x1224   :  { %v1097_v46 = vmul.f32 2.0, %v1568_v45  ;;  %v1096_v0 = vmul.f32 %v1568_v45, %v961_v30 }
0x1226   :  { %v1317_v47 = vadd.f32 -1.0, %v1097_v46 }
0x1228   :  { %1100 = vrot.lane.b32.xlu1 %v1317_v47, %s1676_s0 }
0x129a   :  { %v1101_v48 = vpop.permute.xlu1 %1100 }
0x129b   :  { %v1103_v5 = vmul.f32 %v1568_v45, %v1101_v48 }
0x129d   :  { %1105 = vrot.lane.b32.xlu0 %v1103_v5, %s1681_s2 }
0x130f   :  { %v1106_v49 = vpop.permute.xlu0 %1105 }
0x1310   :  { %v1108_v50 = vadd.f32 %v1106_v49, %v1096_v0 }
0x1312   :  { %1569 = vtanh.f32 %v1108_v50 }
0x131c   :  { %v1570_v52 = vpop.eup %1569 }
0x131d   :  { %1111 = vrot.lane.b32.xlu1 %v1570_v52, %s1676_s0 }
0x138f   :  { %v1112_v53 = vpop.permute.xlu1 %1111 }
0x1390   :  { %v1114_v54 = vmul.f32 %v1568_v45, %v1112_v53 }
0x1392   :  { %v1117_v55 = vpack.c.bf16 %v1114_v54, %v1114_v54 }
0x1394   :  { %1119 = vrot.lane.b32.xlu0 %v1117_v55, %s1681_s2 }
0x1406   :  { %v1120_v58 = vpop.permute.xlu0 %1119 }
0x1407   :  { %1480 = vmatmul.mubr.msk.bf16.vlgmr.msra.gmra.mrb[20].mxu0 %vm61_vm0, %v1120_v58 }
0x14da   :  { %v1158_v59 = vpop.f32.mrb[20].mxu0 }
0x14db   :  { %v1234_v60 = vadd.f32 %v1233_v56, %v1158_v59  ;;  %v1481_v61 = vpop.f32.mrb[21].mxu0 }
0x14dc   :  { %v1161_v62 = vpop.f32.mrb[22].mxu0 }
0x14dd   :  { %v1320_v63 = vmul.f32 -1.442695, %v1234_v60  ;;  %v1482_v3 = vpop.f32.mrb[23].mxu0 }
0x14df   :  { %1571 = vpow2.f32 %v1320_v63 }
0x14e9   :  { %v1572_v4 = vpop.eup %1571 }
0x14ea   :  { %v1240_v7 = vadd.f32 1.0, %v1572_v4 }
0x14ec   :  { %1573 = vrcp.f32 %v1240_v7 }
0x14f6   :  { %v1574_v8 = vpop.eup %1573 }
0x14f7   :  { %v1244_v9 = vmul.f32 2.0, %v1574_v8  ;;  %v1243_v13 = vmul.f32 %v1574_v8, %v1108_v50 }
0x14f9   :  { %v1321_v10 = vadd.f32 -1.0, %v1244_v9 }
0x14fb   :  { %1247 = vrot.lane.b32.xlu1 %v1321_v10, %s1676_s0 }
0x156d   :  { %v1248_v11 = vpop.permute.xlu1 %1247 }
0x156e   :  { %v1250_v12 = vmul.f32 %v1574_v8, %v1248_v11 }
0x1570   :  { %1252 = vrot.lane.b32.xlu0 %v1250_v12, %s1681_s2 }
0x15e2   :  { %v1253_v14 = vpop.permute.xlu0 %1252 }
0x15e3   :  { %v1255_v15 = vadd.f32 %v1253_v14, %v1243_v13 }
0x15e5   :  { %1575 = vtanh.f32 %v1255_v15 }
0x15ef   :  { %v1576_v16 = vpop.eup %1575 }
0x15f0   :  { %1258 = vrot.lane.b32.xlu1 %v1576_v16, %s1676_s0 }
0x15f4   :  { %1268 = vrot.lane.b32.xlu1 %v1255_v15, %s1682_s23 }
0x1662   :  { %v1259_v17 = vpop.permute.xlu1 %1258 }
0x1663   :  { %v1261_v18 = vmul.f32 %v1574_v8, %v1259_v17 }
0x1665   :  { %1263 = vrot.lane.b32.xlu0 %v1261_v18, %s1681_s2 }
0x1666   :  { %v1269_v19 = vpop.permute.xlu1 %1268 }
0x1667   :  { %1271 = vst.msk [vmem:[#allocation2] sm:$0xff] %vm61_vm0, %v1269_v19 }
0x16d7   :  { %v1264_v20 = vpop.permute.xlu0 %1263 }
0x16d8   :  { %1266 = vst.msk [vmem:[#allocation9] sm:$0xff] %vm61_vm0, %v1264_v20 }
0x16d9   :  { %1654 = shalt.err (!%p1651_p0)
}
0x16da   :  { %s1655_s29 = scalar_lea.hbm %s1905_s3, 128 }
0x16db   :  { %p1656_p1 = scmp.ne.s32.totalorder %s1905_s3, %s1655_s29  ;;  %p1659_p2 = scmp.lt.u32.totalorder %s1655_s29, %s1905_s3 }
0x16dd   :  { %p1661_p3 = pnand %p1659_p2, %p1656_p1 }
0x16df   :  { %1664 = shalt.err (!%p1661_p3)
}
0x16e0   :  { %1281 = dma.vmem_to_hbm [thread:$0]  %s1279_s25, 128, %s1905_s3, [#allocation5]  }
0x16e1   :  { %1669 = dma.done.wait [#allocation5], 128  }
0x16e2   :  { %1670 = vsyncadd [#allocation5], 4294967168 }
0x16e3   :  { %1285 = vsyncpa [#allocation4], 1 }
0x16e4   :  { %1286 = vsyncpa [#allocation7], 1 }
0x16e5   :  { %1287 = vsyncpa [#allocation5], 1 }

</bundles_post_ra>
